<compile_context>
chip_gen: v7x
topology: tpu7x:2x2x1
jax: 0.10.0
libtpu: 0.0.40
codegen_flags: <defaults>
</compile_context>

<pallas_src>
import jax
import jax.numpy as jnp
import numpy as np
from jax.experimental import pallas as pl
from jax.experimental.pallas import tpu as pltpu


# ------------------------- fused forward Pallas kernel -------------------------

def _make_fused_kernel(Bblk, H, Hp, Nwc, KH):
    """conv3x3(SAME)+bias+ReLU -> GAP -> linear head, fused, batch-blocked."""

    def kernel(x_ref, wcat_ref, head_ref, out_ref):
        # x_ref    : (Bblk*Hp, Kp)    bf16  Bblk zero-padded images stacked on M
        # wcat_ref : (Kp, KH*Nwc)     bf16  3 kernel-row weight bands, concat on N
        # head_ref : (Nwc+16, head_w) f32   rows [0:Nwc]=Wc, row Nwc=conv bias,
        #                                   row Nwc+8=fc bias (lane-padded)
        # out_ref  : (1, Bblk, head_w) f32  lane-padded logits
        y = jnp.dot(x_ref[...], wcat_ref[...],
                    preferred_element_type=jnp.float32)          # one MXU pass
        y = y.reshape(Bblk, Hp, KH * Nwc)
        # acc[b, h, :] = sum_dh y[b, h+dh, dh-th N band]  (row shifts -> XLU)
        acc = y[:, 0:H, 0:Nwc]
        for dh in range(1, KH):
            acc = acc + y[:, dh:dh + H, dh * Nwc:(dh + 1) * Nwc]
        cb = head_ref[Nwc:Nwc + 1, 0:Nwc]                        # (1, Nwc)
        h_act = jnp.maximum(acc + cb, 0.0)                       # conv bias + ReLU
        colsum = jnp.sum(h_act, axis=1)                          # (Bblk, Nwc) GAP row-sum
        wc = head_ref[0:Nwc, :]                                  # (Nwc, head_w) GAP∘FC folded
        fb = head_ref[Nwc + 8:Nwc + 9, :]                        # (1, head_w)
        out_ref[0] = jnp.dot(colsum, wc,
                             preferred_element_type=jnp.float32) + fb

    return kernel


def _choose_bblk(B):
    """Images per grid step: fat blocks, but >= 2 grid steps when B >= 2 (v7x)."""
    if B >= 16:
        return 8
    return max(1, (B + 1) // 2)


def _prepare_constants(params, H, W, Kp, head_w):
    """Built ONCE per model (not per forward call)."""
    conv_w = params["conv_w"].astype(jnp.float32)      # (3, 3, Cin, Cmid)
    conv_b = params["conv_b"].astype(jnp.float32)      # (Cmid,)
    fc_w = params["fc_w"].astype(jnp.float32)          # (Cmid + n_meta, n_cls)
    fc_b = params["fc_b"].astype(jnp.float32)          # (n_cls,)
    KH, KW, Cin, Cmid = conv_w.shape
    n_cls = fc_w.shape[-1]
    K = (W + 2) * Cin
    Nwc = W * Cmid

    # Width-banded conv weights: Wband[d, p*Cin+ci, v*Cmid+co] = conv_w[d, p-v, ci, co]
    p_idx = jnp.arange(W + 2)
    v_idx = jnp.arange(W)
    d_idx = jnp.arange(KW)
    band = (p_idx[:, None, None] == v_idx[None, :, None] + d_idx[None, None, :])
    wband = jnp.einsum("pvd,hdic->hpivc", band.astype(jnp.float32), conv_w)
    wband = wband.reshape(KH, K, Nwc)
    wband = jnp.pad(wband, ((0, 0), (0, Kp - K), (0, 0)))        # zero-pad K -> 128
    wcat = jnp.concatenate([wband[d] for d in range(KH)],
                           axis=1).astype(jnp.bfloat16)          # (Kp, KH*Nwc)

    # Fold GAP + image half of the FC head into one (Nwc, n_cls) matrix.
    # meta is always zeros under WrappedModel -> fc_w[Cmid:] contributes nothing.
    ssum = jnp.tile(jnp.eye(Cmid, dtype=jnp.float32), (W, 1))    # (Nwc, Cmid)
    wc = (ssum @ fc_w[:Cmid]) * (1.0 / (H * W))                  # (Nwc, n_cls)
    cb_tiled = jnp.tile(conv_b, W)                               # (Nwc,)

    head = jnp.zeros((Nwc + 16, head_w), jnp.float32)
    head = head.at[:Nwc, :n_cls].set(wc)
    head = head.at[Nwc, :Nwc].set(cb_tiled)
    head = head.at[Nwc + 8, :n_cls].set(fc_b)
    return wcat, head


def make_wrapped_model(params, img_hw, use_text=False, text_feature=None):
    """Returns a jitted callable with WrappedModel.forward semantics."""
    H, W = img_hw
    KH, KW, Cin, Cmid = params["conv_w"].shape
    n_cls = params["fc_w"].shape[-1]
    Nwc = W * Cmid
    K = (W + 2) * Cin
    Kp = 128 * pl.cdiv(K, 128)
    Hp = 8 * pl.cdiv(H + 2, 8)                 # padded rows, multiple of 8 sublanes
    head_w = 128 * pl.cdiv(max(Nwc, n_cls), 128)
    wcat, head = _prepare_constants(params, H, W, Kp, head_w)

    def forward(paired_img):
        # Exact WrappedModel.forward semantics: meta = zeros(B, 2) (zero
        # contribution -> folded out), return model(...)[0] == logits.
        B = paired_img.shape[0]
        Bblk = _choose_bblk(B)
        nB = pl.cdiv(B, Bblk)
        B_pad = nB * Bblk

        x = jnp.transpose(paired_img, (0, 2, 3, 1)).astype(jnp.float32)  # NCHW->NHWC
        # zero-pad: batch -> B_pad, rows -> Hp (SAME top pad + bottom), cols -> W+2
        xp = jnp.pad(x, ((0, B_pad - B), (1, Hp - H - 1), (1, 1), (0, 0)))
        x2d = xp.reshape(B_pad, Hp, K)
        x2d = jnp.pad(x2d, ((0, 0), (0, 0), (0, Kp - K)))                # lanes -> 128
        x_flat = x2d.reshape(B_pad * Hp, Kp).astype(jnp.bfloat16)        # bf16 HBM stream

        kernel = _make_fused_kernel(Bblk, H, Hp, Nwc, KH)
        logits_pad = pl.pallas_call(
            kernel,
            out_shape=jax.ShapeDtypeStruct((nB, Bblk, head_w), jnp.float32),
            grid_spec=pltpu.PrefetchScalarGridSpec(
                num_scalar_prefetch=0,
                grid=(nB,),
                in_specs=[
                    pl.BlockSpec((Bblk * Hp, Kp), lambda b: (b, 0)),
                    pl.BlockSpec((Kp, KH * Nwc), lambda b: (0, 0)),   # resident weights
                    pl.BlockSpec(head.shape, lambda b: (0, 0)),       # resident head
                ],
                out_specs=pl.BlockSpec((1, Bblk, head_w), lambda b: (b, 0, 0)),
            ),
            compiler_params=pltpu.CompilerParams(
                dimension_semantics=("parallel",)),     # v7x: TCs split the batch blocks
        )(x_flat, wcat, head)

        logits = logits_pad.reshape(B_pad, head_w)[:B, :n_cls]
        if use_text and text_feature is not None:
            # TODO(synk): real text-fusion semantics of the wrapped model are unknown;
            # stand-in text bias applied outside the kernel (default use_text=False).
            logits = logits + text_feature.astype(jnp.float32) @ params["fc_w"]
        return logits

    return jax.jit(forward)


# ----------------------------- synthetic model ------------------------------

def init_params(key, c_in=4, c_mid=8, n_meta=2, n_classes=3):
    k1, k2, k3, k4 = jax.random.split(key, 4)
    return {
        "conv_w": 0.05 * jax.random.normal(k1, (3, 3, c_in, c_mid), jnp.float32),
        "conv_b": 0.01 * jax.random.normal(k2, (c_mid,), jnp.float32),
        "fc_w": 0.05 * jax.random.normal(k3, (c_mid + n_meta, n_classes), jnp.float32),
        "fc_b": 0.01 * jax.random.normal(k4, (n_classes,), jnp.float32),
    }


# ------------------------------- reference -----------------------------------

def _reference_forward(params, paired_img):
    """Pure-jnp (XLA) f32 reference: conv3x3+bias+ReLU -> GAP -> concat(zeros meta) -> FC."""
    x = jnp.transpose(paired_img, (0, 2, 3, 1)).astype(jnp.float32)
    B, H, W, _ = x.shape
    xp = jnp.pad(x, ((0, 0), (1, 1), (1, 1), (0, 0)))
    out = jnp.zeros((B, H, W, params["conv_w"].shape[-1]), jnp.float32)
    for dh in range(3):
        for dw in range(3):
            out = out + jnp.einsum("bhwc,cd->bhwd",
                                   xp[:, dh:dh + H, dw:dw + W, :],
                                   params["conv_w"][dh, dw])
    h = jnp.maximum(out + params["conv_b"], 0.0)
    pooled = jnp.mean(h, axis=(1, 2))
    feat = jnp.concatenate([pooled, jnp.zeros((B, 2), jnp.float32)], axis=-1)
    return feat @ params["fc_w"] + params["fc_b"]


# ----------------------------------- main ------------------------------------

if __name__ == "__main__":
    key = jax.random.PRNGKey(0)
    kp, kx, kx2 = jax.random.split(key, 3)
    params = init_params(kp)

    forward = make_wrapped_model(params, img_hw=(16, 16))

    # Spec-sized batch (B=2): Bblk=1, grid=(2,) — both v7x TensorCores get a step.
    paired_img = jax.random.normal(kx, (2, 4, 16, 16), jnp.float32)  # NCHW
    out = jax.block_until_ready(forward(paired_img))
    assert out.shape == (2, 3) and out.dtype == jnp.float32
    ref = _reference_forward(params, paired_img)
    assert np.allclose(np.asarray(out), np.asarray(ref), atol=1e-2, rtol=1e-2), (out, ref)

    # Larger batch exercises the batch-blocked path (Bblk=8, M = 8*24 = 192 per step).
    paired_img16 = jax.random.normal(kx2, (16, 4, 16, 16), jnp.float32)
    out16 = jax.block_until_ready(forward(paired_img16))
    assert out16.shape == (16, 3)
    ref16 = _reference_forward(params, paired_img16)
    assert np.allclose(np.asarray(out16), np.asarray(ref16), atol=1e-2, rtol=1e-2)

    print("KERNEL_OK")
</pallas_src>

<mosaic_0001>
module attributes {stable_mosaic.version = 11 : i64} {
  func.func @kernel(%arg0: i32, %arg1: memref<24x128xbf16, #tpu.memory_space<vmem>>, %arg2: memref<128x384xbf16, #tpu.memory_space<vmem>>, %arg3: memref<144x128xf32, #tpu.memory_space<vmem>>, %arg4: memref<1x1x128xf32, #tpu.memory_space<vmem>>) attributes {dimension_semantics = [#tpu.dimension_semantics<parallel>], iteration_bounds = array<i64: 2>, scalar_prefetch = 0 : i64, scratch_operands = 0 : i64, tpu.core_type = #tpu.core_type<tc>, window_params = [{transform_indices = @transform_0, window_bounds = array<i64: 24, 128>}, {pipeline_mode = #tpu.pipeline_mode<synchronous>, transform_indices = @transform_1, window_bounds = array<i64: 128, 384>}, {pipeline_mode = #tpu.pipeline_mode<synchronous>, transform_indices = @transform_2, window_bounds = array<i64: 144, 128>}, {transform_indices = @transform_3, window_bounds = array<i64: 1, 1, 128>}]} {
    %c0 = arith.constant 0 : index
    %c0_0 = arith.constant 0 : index
    %0 = vector.load %arg1[%c0, %c0_0] : memref<24x128xbf16, #tpu.memory_space<vmem>>, vector<24x128xbf16>
    %c0_1 = arith.constant 0 : index
    %c0_2 = arith.constant 0 : index
    %1 = vector.load %arg2[%c0_1, %c0_2] : memref<128x384xbf16, #tpu.memory_space<vmem>>, vector<128x384xbf16>
    %cst = arith.constant dense<0.000000e+00> : vector<24x384xf32>
    %2 = tpu.matmul %0, %1, %cst {dimension_numbers = #tpu.dot_dimension_numbers<[1], [0], [0], [1], [0, 0, 1, 1], [], []>} : vector<24x128xbf16>, vector<128x384xbf16>, vector<24x384xf32> -> vector<24x384xf32>
    %3 = vector.shape_cast %2 : vector<24x384xf32> to vector<1x24x384xf32>
    %4 = vector.extract_strided_slice %3 {offsets = [0, 0, 0], sizes = [1, 16, 128], strides = [1, 1, 1]} : vector<1x24x384xf32> to vector<1x16x128xf32>
    %5 = vector.extract_strided_slice %3 {offsets = [0, 1, 128], sizes = [1, 16, 128], strides = [1, 1, 1]} : vector<1x24x384xf32> to vector<1x16x128xf32>
    %6 = arith.addf %4, %5 : vector<1x16x128xf32>
    %7 = vector.extract_strided_slice %3 {offsets = [0, 2, 256], sizes = [1, 16, 128], strides = [1, 1, 1]} : vector<1x24x384xf32> to vector<1x16x128xf32>
    %8 = arith.addf %6, %7 : vector<1x16x128xf32>
    %c128 = arith.constant 128 : index
    %c0_3 = arith.constant 0 : index
    %9 = vector.load %arg3[%c128, %c0_3] : memref<144x128xf32, #tpu.memory_space<vmem>>, vector<1x128xf32>
    %10 = vector.shape_cast %9 : vector<1x128xf32> to vector<1x1x128xf32>
    %11 = vector.broadcast %10 : vector<1x1x128xf32> to vector<1x16x128xf32>
    %12 = arith.addf %8, %11 : vector<1x16x128xf32>
    %cst_4 = arith.constant 0.000000e+00 : f32
    %13 = vector.broadcast %cst_4 : f32 to vector<1x16x128xf32>
    %14 = arith.maximumf %12, %13 : vector<1x16x128xf32>
    %cst_5 = arith.constant dense<0.000000e+00> : vector<1x128xf32>
    %15 = vector.multi_reduction <add>, %14, %cst_5 [1] : vector<1x16x128xf32> to vector<1x128xf32>
    %c0_6 = arith.constant 0 : index
    %c0_7 = arith.constant 0 : index
    %16 = vector.load %arg3[%c0_6, %c0_7] : memref<144x128xf32, #tpu.memory_space<vmem>>, vector<128x128xf32>
    %c136 = arith.constant 136 : index
    %c0_8 = arith.constant 0 : index
    %17 = vector.load %arg3[%c136, %c0_8] : memref<144x128xf32, #tpu.memory_space<vmem>>, vector<1x128xf32>
    %cst_9 = arith.constant dense<0.000000e+00> : vector<1x128xf32>
    %18 = tpu.matmul %15, %16, %cst_9 {dimension_numbers = #tpu.dot_dimension_numbers<[1], [0], [0], [1], [0, 0, 1, 1], [], []>} : vector<1x128xf32>, vector<128x128xf32>, vector<1x128xf32> -> vector<1x128xf32>
    %19 = arith.addf %18, %17 : vector<1x128xf32>
    %c0_10 = arith.constant 0 : index
    %c0_11 = arith.constant 0 : index
    %c0_12 = arith.constant 0 : index
    %20 = vector.load %arg4[%c0_10, %c0_11, %c0_12] : memref<1x1x128xf32, #tpu.memory_space<vmem>>, vector<1x1x128xf32>
    %21 = vector.shape_cast %20 : vector<1x1x128xf32> to vector<1x128xf32>
    %22 = vector.shape_cast %19 : vector<1x128xf32> to vector<1x1x128xf32>
    tpu.vector_store %arg4[%c0_10, %c0_11, %c0_12], %22 {strides = array<i32>} : memref<1x1x128xf32, #tpu.memory_space<vmem>>, vector<1x1x128xf32>,
    return
  }
  func.func @transform_0(%arg0: i32) -> (i32, i32) {
    %c0_i32 = arith.constant 0 : i32
    %c0_i32_0 = arith.constant 0 : i32
    return %arg0, %c0_i32 : i32, i32
  }
  func.func @transform_1(%arg0: i32) -> (i32, i32) {
    %c0_i32 = arith.constant 0 : i32
    %c0_i32_0 = arith.constant 0 : i32
    %c0_i32_1 = arith.constant 0 : i32
    return %c0_i32, %c0_i32_0 : i32, i32
  }
  func.func @transform_2(%arg0: i32) -> (i32, i32) {
    %c0_i32 = arith.constant 0 : i32
    %c0_i32_0 = arith.constant 0 : i32
    %c0_i32_1 = arith.constant 0 : i32
    return %c0_i32, %c0_i32_0 : i32, i32
  }
  func.func @transform_3(%arg0: i32) -> (i32, i32, i32) {
    %c0_i32 = arith.constant 0 : i32
    %c0_i32_0 = arith.constant 0 : i32
    %c0_i32_1 = arith.constant 0 : i32
    return %arg0, %c0_i32, %c0_i32_0 : i32, i32, i32
  }
}

</mosaic_0001>

<bundles_post_ra>
// kernel: forward.1
= control target key start
LH: loop header
LB: loop body
LE: loop exit
PB: predicated region body
PF: predicated region fallthrough
CT: control target
= control target key end

     0   :  { %8 = vsyncpa [#allocation3], 0  ;;  %s1176_s0 = inlined_call_operand.vmem [shape: bf16[48,128], index: 0, kind: input, shape index: {}]   ;;  %s1177_s1 = inlined_call_operand.vmem [shape: bf16[128,384], index: 1, kind: input, shape index: {}]   ;;  %s1178_s2 = inlined_call_operand.vmem [shape: f32[144,128], index: 2, kind: input, shape index: {}]   ;;  %s1179_s3 = inlined_call_operand.hbm [shape: f32[2,1,128], index: 3, kind: output, shape index: {}]  }
   0x1   :  { %10 = vsyncpa [#allocation3 + $0x1], 0  ;;  %s947_s12 = smov 0   ;;  %s949_s13 = smov 0  }
   0x2   :  { %s951_s14 = smov 0   ;;  %s953_s15 = smov 0  }
   0x3 LB: > { %s968_s16 = sadd.s32 4294967295, %s920_s15   ;;  %s640_s17 = sadd.s32 4294967294, %s920_s15   ;;  %s920_s15 = sphi %s953_s15, %s1185_s15   ;;  %s916_s14 = sphi %s951_s14, %s1184_s14   ;;  %s912_s13 = sphi %s949_s13, %s1183_s13   ;;  %s908_s12 = sphi %s947_s12, %s1182_s12  }
   0x4   : > { %s972_s18 = sadd.s32 1, %s920_s15   ;;  %s91_s19 = sadd.s32 1, %s916_s14 }
   0x5   : > { %s88_s20 = ssub.s32 %s920_s15, %s972_s18  ;;  %p101_p0 = scmp.ne.s32.totalorder %s916_s14, %s912_s13 }
   0x6   : > { %p89_p1 = scmp.eq.s32.totalorder %s88_s20, 0  ;;  %p102_p2 = scmp.eq.s32.totalorder %s968_s16, 1 }
   0x7   : > { %p107_p3 = scmp.ne.s32.totalorder %s912_s13, %s908_s12  ;;  %p108_p4 = scmp.eq.s32.totalorder %s640_s17, 1 }
   0x8   : > { %s983_s21 = scalar_select %p89_p1, %s916_s14, %s91_s19  }
   0x9   : > { %p985_p5 = por %p102_p2, %p101_p0  ;;  %p989_p6 = por %p108_p4, %p107_p3 }
   0xa   : > { %p643_p7 = scmp.ge.s32.totalorder %s920_s15, 1  ;;  %p141_p8 = scmp.lt.s32.totalorder %s920_s15, 3 }
   0xc   : > { %p142_p9 = pnand %p643_p7, %p141_p8 }
   0xd   : > { %v824_v0 = vld [vmem:[%s1177_s1 + $0x4] ss:$12 sps:$4 sm:$0xff] (!%p142_p9)   ;;  %s164_s26 = smul.u32 (!%p142_p9), 3, %s968_s16  ;;  %v826_v1 = vld [vmem:[%s1177_s1] ss:$12 sps:$4 sm:$0xff] (!%p142_p9)   ;;  %v922_v2 = vmov (!%p142_p9), 0  }
   0xe   : > { %145 = sbr.rel (%p142_p9) target bundleno = 520 (0x208), region = 32  ;;  %376 = vmatprep.mubr.bf16.mxu0 (!%p142_p9), %v922_v2  ;;  %344 = vmatprep.subr.bf16.mxu0 (!%p142_p9), %v824_v0  ;;  %v827_v3 = vld [vmem:[%s1177_s1 + $0x8] ss:$12 sps:$4 sm:$0xff] (!%p142_p9)   ;;  %v830_v5 = vld [vmem:[%s1177_s1 + $0x18] ss:$12 sps:$4 sm:$0xff] (!%p142_p9)   ;;  %v923_v30 = vmov (!%p142_p9), 0.0|0.0  }
   0xf   : > { %345 = vmatpush1.bf16.msra.mxu0 (!%p142_p9), %v826_v1  ;;  %v828_v4 = vld [vmem:[%s1177_s1 + $0x1c] ss:$12 sps:$4 sm:$0xff] (!%p142_p9)   ;;  %702 = vmatprep.subr.bf16.mxu1 (!%p142_p9), %v827_v3  ;;  %v831_v6 = vld [vmem:[%s1177_s1 + $0x20] ss:$12 sps:$4 sm:$0xff] (!%p142_p9)   ;;  %p165_p10 = scmp.lt.s32.totalorder (!%p142_p9), %s164_s26, 5  ;;  %v486_v31 = vld [vmem:[%s1178_s2 + $0x10] sm:$0xff] (!%p142_p9) }
  0x10   : > { %703 = vmatpush3.bf16.msra.mxu1 (!%p142_p9), %v827_v3  ;;  %346 = vmatprep.subr.bf16.mxu0 (!%p142_p9), %v828_v4  ;;  %v832_v7 = vld [vmem:[%s1177_s1 + $0x34] ss:$12 sps:$4 sm:$0xff] (!%p142_p9)   ;;  %v835_v8 = vld [vmem:[%s1177_s1 + $0x38] ss:$12 sps:$4 sm:$0xff] (!%p142_p9)   ;;  %v834_v9 = vld [vmem:[%s1177_s1 + $0x30] ss:$12 sps:$4 sm:$0xff] (!%p142_p9)  }
  0x11   : > { %704 = vmatprep.subr.bf16.mxu1 (!%p142_p9), %v831_v6  ;;  %v836_v10 = vld [vmem:[%s1177_s1 + $0x4c] ss:$12 sps:$4 sm:$0xff] (!%p142_p9)   ;;  %v839_v11 = vld [vmem:[%s1177_s1 + $0x50] ss:$12 sps:$4 sm:$0xff] (!%p142_p9)   ;;  %v838_v12 = vld [vmem:[%s1177_s1 + $0x48] ss:$12 sps:$4 sm:$0xff] (!%p142_p9)  }
  0x12   : > { %v840_v13 = vld [vmem:[%s1177_s1 + $0x64] ss:$12 sps:$4 sm:$0xff] (!%p142_p9)   ;;  %v843_v14 = vld [vmem:[%s1177_s1 + $0x68] ss:$12 sps:$4 sm:$0xff] (!%p142_p9)   ;;  %v842_v15 = vld [vmem:[%s1177_s1 + $0x60] ss:$12 sps:$4 sm:$0xff] (!%p142_p9)  }
  0x13   : > { %347 = vmatpush1.bf16.msra.mxu0 (!%p142_p9), %v830_v5  ;;  %v844_v16 = vld [vmem:[%s1177_s1 + $0x7c] ss:$12 sps:$4 sm:$0xff] (!%p142_p9)   ;;  %v846_v17 = vld [vmem:[%s1177_s1 + $0x78] ss:$12 sps:$4 sm:$0xff] (!%p142_p9)   ;;  %v847_v18 = vld [vmem:[%s1177_s1 + $0x80] ss:$12 sps:$4 sm:$0xff] (!%p142_p9)  }
  0x14   : > { %348 = vmatprep.subr.bf16.mxu0 (!%p142_p9), %v832_v7  ;;  %705 = vmatpush3.bf16.msra.mxu1 (!%p142_p9), %v831_v6  ;;  %v848_v20 = vld [vmem:[%s1177_s1 + $0x94] ss:$12 sps:$4 sm:$0xff] (!%p142_p9)   ;;  %v851_v21 = vld [vmem:[%s1177_s1 + $0x98] ss:$12 sps:$4 sm:$0xff] (!%p142_p9)   ;;  %v850_v22 = vld [vmem:[%s1177_s1 + $0x90] ss:$12 sps:$4 sm:$0xff] (!%p142_p9)  }
  0x15   : > { %s1187_s26 = smov (!%p165_p10, %s164_s26), 5  ;;  %706 = vmatprep.subr.bf16.mxu1 %v835_v8  ;;  %v852_v23 = vld [vmem:[%s1177_s1 + $0xac] ss:$12 sps:$4 sm:$0xff]   ;;  %v855_v24 = vld [vmem:[%s1177_s1 + $0xb0] ss:$12 sps:$4 sm:$0xff]   ;;  %v484_v27 = vld [vmem:[%s1178_s2] sm:$0xff] }
  0x16   : > { %s644_s7 = sshll.u32 %s1187_s26, 2  ;;  %v854_v25 = vld [vmem:[%s1177_s1 + $0xa8] ss:$12 sps:$4 sm:$0xff]   ;;  %v487_v32 = vld [vmem:[%s1178_s2 + $0x18] sm:$0xff]  ;;  %v488_v34 = vld [vmem:[%s1178_s2 + $0x20] sm:$0xff]  ;;  %vm924_vm0 = vmmov 0  }
  0x17   : > { %349 = vmatpush1.bf16.msra.mxu0 %v834_v9  ;;  %s168_s25 = scalar_lea.vmem %s1176_s0, %s644_s7  ;;  %v485_v28 = vld [vmem:[%s1178_s2 + $0x8] sm:$0xff]  ;;  %v761_v33 = vpack.c.bf16 %v487_v32, %v486_v31  ;;  %v490_v37 = vld [vmem:[%s1178_s2 + $0x30] sm:$0xff]  ;;  %v491_v38 = vld [vmem:[%s1178_s2 + $0x38] sm:$0xff]  ;;  %v925_v51 = vmov 0.0   ;;  %vm445_vm1 = vcmask 1046528   ;;  %vm458_vm2 = vcmask 1045504  }
  0x18   : > { %350 = vmatprep.subr.bf16.mxu0 %v836_v10  ;;  %707 = vmatpush3.bf16.msra.mxu1 %v835_v8  ;;  %v856_v19 = vld [vmem:[%s168_s25] sm:$0xff]   ;;  %v857_v26 = vld [vmem:[%s168_s25 + $0x8] ss:$0 sps:$4 sm:$0xff]   ;;  %v758_v29 = vpack.c.bf16 %v485_v28, %v484_v27  ;;  %v767_v39 = vpack.c.bf16 %v491_v38, %v490_v37  ;;  %v494_v43 = vld [vmem:[%s1178_s2 + $0x50] sm:$0xff]  ;;  %s162_s19 = sand.u32 1, %s912_s13   ;;  %s672_s26 = sshll.u32 %s968_s16, 4 }
  0x19   : > { %708 = vmatprep.subr.bf16.mxu1 %v839_v11  ;;  %718 = vmatprep.mubr.bf16.mxu1 %v856_v19  ;;  %v489_v35 = vld [vmem:[%s1178_s2 + $0x28] sm:$0xff]  ;;  %v492_v40 = vld [vmem:[%s1178_s2 + $0x40] sm:$0xff]  ;;  %v495_v44 = vld [vmem:[%s1178_s2 + $0x58] sm:$0xff]  ;;  %s163_s27 = scalar_lea.vmem [#allocation2], %s162_s19  ;;  %s1134_s30 = scalar_lea.hbm %s1179_s3, %s672_s26 }
  0x1a   : > { %v764_v36 = vpack.c.bf16 %v489_v35, %v488_v34  ;;  %v493_v41 = vld [vmem:[%s1178_s2 + $0x48] sm:$0xff]  ;;  %v773_v45 = vpack.c.bf16 %v495_v44, %v494_v43  ;;  %v496_v46 = vld [vmem:[%s1178_s2 + $0x60] sm:$0xff]  ;;  %v498_v48 = vld [vmem:[%s1178_s2 + $0x70] sm:$0xff]  ;;  %s585_s28 = sshll.u32 %s163_s27, 4  ;;  %s573_s4 = scalar_lea.sflag [#allocation3], %s162_s19  ;;  %s1136_s28 = int_to_ptr.vmem [resolvable:$true] %s585_s28 }
  0x1b   : > { %351 = vmatpush1.bf16.msra.mxu0 %v838_v12  ;;  %v770_v42 = vpack.c.bf16 %v493_v41, %v492_v40  ;;  %v497_v47 = vld [vmem:[%s1178_s2 + $0x68] sm:$0xff]  ;;  %v499_v50 = vld [vmem:[%s1178_s2 + $0x78] sm:$0xff]  ;;  %v671_v12 = vld [vmem:[%s1178_s2 + $0x80] ss:$0 sm:$0xff]  ;;  %s858_s5 = scalar_lea.vmem %s1136_s28, 16  ;;  %s926_s16 = smov [#allocation2]  }
  0x1c   : > { %352 = vmatprep.subr.bf16.mxu0 %v840_v13  ;;  %709 = vmatpush3.bf16.msra.mxu1 %v839_v11  ;;  %v776_v49 = vpack.c.bf16 %v497_v47, %v496_v46  ;;  %v779_v52 = vpack.c.bf16 %v499_v50, %v498_v48  ;;  %v500_v27 = vld [vmem:[%s1178_s2 + $0x88] sm:$0x1]  ;;  %p859_p11 = scmp.ne.s32.totalorder %s1136_s28, %s858_s5  ;;  %s862_s6 = sshll.u32 %s926_s16, 4  ;;  %s863_s6 = int_to_ptr.vmem [resolvable:$false] %s862_s6 }
  0x1d   : > { %710 = vmatprep.subr.bf16.mxu1 %v843_v14  ;;  %s864_s7 = scalar_lea.vmem %s863_s6, 32  ;;  %p865_p0 = scmp.lt.s32.totalorder %s1136_s28, %s863_s6 }
  0x1e   : > { %p860_p12 = pnand %p859_p11, %p985_p5  ;;  %p866_p1 = scmp.lt.s32.totalorder %s864_s7, %s858_s5 }
  0x1f   : > { %353 = vmatpush1.bf16.msra.mxu0 %v842_v15 }
  0x20   : > { %354 = vmatprep.subr.bf16.mxu0 %v844_v16  ;;  %711 = vmatpush3.bf16.msra.mxu1 %v843_v14  ;;  %p861_p13 = pneg %p860_p12  ;;  %p867_p2 = por %p866_p1, %p865_p0 }
  0x21   : > { %712 = vmatprep.subr.bf16.mxu1 %v847_v18 }
  0x22   : > { %p868_p3 = pnand %p867_p2, %p861_p13 }
  0x23   : > { %355 = vmatpush1.bf16.msra.mxu0 %v846_v17 }
  0x24   : > { %356 = vmatprep.subr.bf16.mxu0 %v848_v20  ;;  %713 = vmatpush3.bf16.msra.mxu1 %v847_v18 }
  0x25   : > { %714 = vmatprep.subr.bf16.mxu1 %v851_v21 }
  0x27   : > { %357 = vmatpush1.bf16.msra.mxu0 %v850_v22 }
  0x28   : > { %358 = vmatprep.subr.bf16.mxu0 %v852_v23  ;;  %715 = vmatpush3.bf16.msra.mxu1 %v851_v21 }
  0x29   : > { %716 = vmatprep.subr.bf16.mxu1 %v855_v24 }
  0x2b   : > { %359 = vmatpush1.bf16.msra.mxu0 %v854_v25 }
  0x2c   : > { %717 = vmatpush3.bf16.msra.mxu1 %v855_v24  ;;  %757 = vmatprep.subr.bf16.mxu0 %v923_v30 }
  0x2e   : > { %377 = vmatmul.mubr.bf16.vlgmr.msra.gmra.mrb[0].mxu0 %v856_v19 }
  0x2f   : > { %386 = vmatprep.mubr.bf16.mxu0 %v922_v2  ;;  %719 = vmatmul.mubr.bf16.vlgmr.msra.gmra.mrb[0].mxu1 %v857_v26 }
  0x30   : > { %759 = vmatpush3.bf16.msra.mxu0 %v758_v29 }
  0x31   : > { %760 = vmatprep.subr.bf16.mxu0 %v923_v30 }
  0x34   : > { %762 = vmatpush3.bf16.msra.mxu0 %v761_v33 }
  0x35   : > { %763 = vmatprep.subr.bf16.mxu0 %v923_v30 }
  0x36   : > { %387 = vmatmul.mubr.bf16.gmra.mrb[4].mxu0 %v857_v26 }
  0x37   : > { %754 = vmatprep.mubr.msk.f32.mxu0 %vm924_vm0, %v925_v51 }
  0x38   : > { %765 = vmatpush3.bf16.msra.mxu0 %v764_v36 }
  0x39   : > { %766 = vmatprep.subr.bf16.mxu0 %v923_v30 }
  0x3c   : > { %768 = vmatpush3.bf16.msra.mxu0 %v767_v39 }
  0x3d   : > { %769 = vmatprep.subr.bf16.mxu0 %v923_v30 }
  0x40   : > { %771 = vmatpush3.bf16.msra.mxu0 %v770_v42 }
  0x41   : > { %772 = vmatprep.subr.bf16.mxu0 %v923_v30 }
  0x44   : > { %774 = vmatpush3.bf16.msra.mxu0 %v773_v45 }
  0x45   : > { %775 = vmatprep.subr.bf16.mxu0 %v923_v30 }
  0x48   : > { %777 = vmatpush3.bf16.msra.mxu0 %v776_v49 }
  0x49   : > { %778 = vmatprep.subr.bf16.mxu0 %v923_v30 }
  0x4c   : > { %780 = vmatpush3.bf16.msra.mxu0 %v779_v52 }
 0x101   : > { %v378_v53 = vpop.f32.mrb[0].mxu0 }
 0x102   : > { %v380_v54 = vpop.f32.mrb[1].mxu0  ;;  %v720_v56 = vpop.f32.mrb[0].mxu1 }
 0x103   : > { %v382_v55 = vpop.f32.mrb[2].mxu0  ;;  %v428_v58 = vpop.f32.mrb[1].mxu1  ;;  %v446_v59 = vrot.slane %v380_v54, 1  ;;  %v462_v60 = vrot.slane %v720_v56, 2 }
 0x104   : > { %v384_v57 = vpop.f32.mrb[3].mxu0  ;;  %v459_v62 = vrot.slane %v428_v58, 2  ;;  %v721_v63 = vpop.f32.mrb[2].mxu1 }
 0x105   : > { %v447_v61 = vrot.slane %v384_v57, 1  ;;  %v431_v0 = vpop.f32.mrb[3].mxu1 }
 0x106   : > { %v460_v2 = vrot.slane %v431_v0, 2 }
 0x107   : > { %v448_v1 = vsel %vm445_vm1, %v446_v59, %v447_v61 }
 0x108   : > { %v453_v3 = vadd.f32 %v448_v1, %v378_v53  ;;  %v461_v4 = vsel %vm458_vm2, %v459_v62, %v460_v2  ;;  %v463_v5 = vsel %vm458_vm2, %v460_v2, %v462_v60 }
 0x109   : > { %v388_v6 = vpop.f32.mrb[4].mxu0 }
 0x10a   : > { %v466_v7 = vadd.f32 %v461_v4, %v453_v3  ;;  %v389_v8 = vpop.f32.mrb[5].mxu0 }
 0x10b   : > { %v449_v9 = vrot.slane %v389_v8, 1  ;;  %v391_v10 = vpop.f32.mrb[6].mxu0 }
 0x10c   : > { %v392_v11 = vpop.f32.mrb[7].mxu0  ;;  %v473_v15 = vadd.f32 %v671_v12, %v466_v7 }
 0x10d   : > { %v450_v13 = vsel %vm445_vm1, %v447_v61, %v449_v9 }
 0x10e   : > { %v454_v14 = vadd.f32 %v450_v13, %v382_v55  ;;  %v475_v18 = vmax.f32 %v473_v15, 0.0 }
 0x110   : > { %v467_v16 = vadd.f32 %v463_v5, %v454_v14 }
 0x112   : > { %v474_v17 = vadd.f32 %v671_v12, %v467_v16 }
 0x114   : > { %v476_v19 = vmax.f32 %v474_v17, 0.0 }
 0x116   : > { %v477_v20 = vadd.f32 %v476_v19, %v475_v18 }
 0x118   : > { %v478_v21 = vrot.slane %v477_v20, 4 }
 0x11a   : > { %v479_v22 = vadd.f32 %v478_v21, %v477_v20 }
 0x11c   : > { %v480_v23 = vrot.slane %v479_v22, 2 }
 0x11e   : > { %v481_v24 = vadd.f32 %v480_v23, %v479_v22 }
 0x120   : > { %v482_v25 = vrot.slane %v481_v24, 1 }
 0x122   : > { %v483_v26 = vadd.f32 %v482_v25, %v481_v24 }
 0x124   : > { %755 = vmatmul.mubr.f32.vlgmr.msra.gmra.mrb[8].mxu0 %v483_v26 }
 0x1f7   : > { %v567_v28 = vpop.f32.mrb[8].mxu0 }
 0x1f8   : > { %v568_v29 = vadd.f32 %v567_v28, %v500_v27  ;;  %v756_v30 = vpop.f32.mrb[9].mxu0 }
 0x1fa   : > { %571 = vst [vmem:[%s163_s27] sm:$0x1] %v568_v29 }
 0x1fb   : > { %871 = shalt.err (!%p868_p3)
}
 0x1fc   : > { %s872_s8 = scalar_lea.hbm %s1134_s30, 16  ;;  %s876_s11 = scalar_lea.hbm %s1179_s3, 32 }
 0x1fd   : > { %p873_p4 = scmp.ne.s32.totalorder %s1134_s30, %s872_s8  ;;  %p877_p9 = scmp.lt.u32.totalorder %s1134_s30, %s1179_s3 }
 0x1fe   : > { %p878_p10 = scmp.lt.u32.totalorder %s876_s11, %s872_s8  ;;  %p880_p12 = scmp.lt.u32.totalorder %s872_s8, %s1134_s30 }
 0x1ff   : > { %p874_p7 = pnand %p873_p4, %p985_p5 }
 0x200   : > { %p879_p11 = por %p878_p10, %p877_p9 }
 0x201   : > { %p875_p8 = pneg %p874_p7 }
 0x202   : > { %p881_p13 = por %p880_p12, %p879_p11 }
 0x204   : > { %p882_p0 = pnand %p881_p13, %p875_p8 }
 0x206   : > { %885 = shalt.err (!%p882_p0)
}
 0x207   : > { %781 = dma.vmem_to_hbm [thread:$0]  (%p985_p5), %s1136_s28, 16, %s1134_s30, %s573_s4  }
 0x208 PF: > { %p787_p1 = scmp.ge.s32.totalorder %s920_s15, 2  ;;  %s597_s20 = sand.u32 1, %s908_s12  }
 0x209   : > { %s598_s24 = scalar_lea.sflag [#allocation3], %s597_s20 }
 0x20a   : > { %p784_p2 = pnand %p787_p1, %p989_p6 }
 0x20c   : > { %903 = dma.done.wait (!%p784_p2), %s598_s24, 16  }
 0x20d   : > { %905 = vsyncadd (!%p784_p2), %s598_s24, 4294967280  ;;  %p13_p3 = scmp.ge.s32.totalorder %s972_s18, 4   ;;  %s1182_s12 = smov %s912_s13 }
 0x20e   : > { %s1183_s13 = smov %s916_s14  ;;  %s1184_s14 = smov %s983_s21 }
 0x20f   : > { %s1185_s15 = smov %s972_s18  ;;  %15 = sbr.rel (!%p13_p3) target bundleno = 3 (0x3), region = 67 }
 0x216   :  { %602 = vsyncpa [#allocation3], 1 }
 0x217   :  { %604 = vsyncpa [#allocation3 + $0x1], 1 }

</bundles_post_ra>
